<compile_context>
chip_gen: v7x
topology: tpu7x:2x2x1
jax: 0.10.0
libtpu: 0.0.40
codegen_flags: <defaults>
</compile_context>

<pallas_src>
from functools import partial

import jax
import jax.numpy as jnp
import numpy as np
from jax.experimental import pallas as pl
from jax.experimental.pallas import tpu as pltpu

EPSILON = 0.001

TILE_BYTES_TARGET = 2 * 1024 * 1024    # ~2 MiB per x tile: HBM roofline saturates by here
VMEM_LIMIT_BYTES = 32 * 1024 * 1024    # small tiles + f32 temporaries fit; safe on v7x (64 MiB/TC)


def _dice_kernel(alpha_ref, x_ref, o_ref, *, hidden):
    # alpha_ref: (1,) f32 in SMEM (scalar parameter).
    # x_ref / o_ref: (tb, H) VMEM tiles holding the FULL hidden dim.
    x = x_ref[...].astype(jnp.float32)
    avg = jnp.mean(x, axis=1, keepdims=True)                 # x.mean(dim=1, keepdim=True)
    d = x - avg
    # sum((x-avg)^2 + eps, dim=1) == sum((x-avg)^2, dim=1) + H*eps
    var = jnp.sum(d * d, axis=1, keepdims=True) + float(hidden) * EPSILON
    ps = jax.nn.sigmoid(d * jax.lax.rsqrt(var))              # sigmoid((x-avg)/sqrt(var))
    alpha = alpha_ref[0]
    # Folded blend: ps*x + (1-ps)*alpha*x == x * (alpha + ps*(1-alpha))
    o_ref[...] = (x * (alpha + ps * (1.0 - alpha))).astype(o_ref.dtype)


def _pick_batch_tile(B, H, itemsize):
    """Sublane-aligned batch tile: ~2 MiB, >= ~8 grid steps when B allows."""
    if B <= 8:
        return B                                   # full-extent batch dim is always legal
    row_bytes = H * itemsize
    cap = max(8, TILE_BYTES_TARGET // row_bytes)   # bytes budget per x tile
    cap = min(cap, pl.cdiv(B, 8))                  # keep >= ~8 steps (>=4 per TC on v7x)
    tb = max(8, (cap // 8) * 8)                    # multiple of 8 sublanes
    return tb
    # TODO(synk): for extreme H (single row >> 2 MiB) the minimum legal 8-row tile
    # can exceed the budget; a two-pass H-tiled reduction would be needed there.


def dice(x, alpha):
    """Dice activation. x: (B, H), reduction over dim 1. alpha: (1,) parameter."""
    B, H = x.shape
    tb = _pick_batch_tile(B, H, jnp.dtype(x.dtype).itemsize)
    return pl.pallas_call(
        partial(_dice_kernel, hidden=H),
        out_shape=jax.ShapeDtypeStruct((B, H), x.dtype),
        grid=(pl.cdiv(B, tb),),                    # ragged last block: Pallas pads/masks
        in_specs=[
            pl.BlockSpec(memory_space=pltpu.SMEM),       # alpha scalar
            pl.BlockSpec((tb, H), lambda i: (i, 0)),     # x tile (full H -> exact row reduce)
        ],
        out_specs=pl.BlockSpec((tb, H), lambda i: (i, 0)),
        compiler_params=pltpu.CompilerParams(
            dimension_semantics=("parallel",),
            vmem_limit_bytes=VMEM_LIMIT_BYTES,
        ),
    )(alpha, x)


def dice_ref(x, alpha):
    # Pure-JAX reference mirroring the PyTorch forward.
    xf = x.astype(jnp.float32)
    avg = jnp.mean(xf, axis=1, keepdims=True)
    var = jnp.sum((xf - avg) ** 2 + EPSILON, axis=1, keepdims=True)
    ps = jax.nn.sigmoid((xf - avg) / jnp.sqrt(var))
    return (ps * xf + (1.0 - ps) * alpha[0] * xf).astype(x.dtype)


if __name__ == "__main__":
    key = jax.random.PRNGKey(0)
    k_x, k_a, k_x2, k_x3 = jax.random.split(key, 4)

    # Small shape implied by the module: batch=16, hidden=32.
    B, H = 16, 32
    x = jax.random.normal(k_x, (B, H), dtype=jnp.float32)
    alpha = jax.random.normal(k_a, (1,), dtype=jnp.float32)   # nn.Parameter(torch.randn(1))

    out = jax.block_until_ready(dice(x, alpha))
    np.testing.assert_allclose(np.asarray(out), np.asarray(dice_ref(x, alpha)),
                               rtol=1e-5, atol=1e-5)

    # Ragged batch (B not a multiple of the tile) with H not a multiple of 128.
    x2 = jax.random.normal(k_x2, (20, 200), dtype=jnp.float32)
    out2 = jax.block_until_ready(dice(x2, alpha))
    np.testing.assert_allclose(np.asarray(out2), np.asarray(dice_ref(x2, alpha)),
                               rtol=1e-5, atol=1e-5)

    # Larger lane-dense hidden size.
    x3 = jax.random.normal(k_x3, (64, 256), dtype=jnp.float32)
    out3 = jax.block_until_ready(dice(x3, alpha))
    np.testing.assert_allclose(np.asarray(out3), np.asarray(dice_ref(x3, alpha)),
                               rtol=1e-5, atol=1e-5)

    print("KERNEL_OK")
</pallas_src>

<mosaic_0001>
module attributes {stable_mosaic.version = 11 : i64} {
  func.func @_dice_kernel(%arg0: i32, %arg1: memref<1xf32, #tpu.memory_space<smem>>, %arg2: memref<8x32xf32, #tpu.memory_space<vmem>>, %arg3: memref<8x32xf32, #tpu.memory_space<vmem>>) attributes {dimension_semantics = [#tpu.dimension_semantics<parallel>], iteration_bounds = array<i64: 2>, scalar_prefetch = 0 : i64, scratch_operands = 0 : i64, tpu.core_type = #tpu.core_type<tc>, window_params = [{transform_indices = @transform_0, window_bounds = array<i64: 1>}, {transform_indices = @transform_1, window_bounds = array<i64: 8, 32>}, {transform_indices = @transform_2, window_bounds = array<i64: 8, 32>}]} {
    %c0 = arith.constant 0 : index
    %c0_0 = arith.constant 0 : index
    %0 = vector.load %arg2[%c0, %c0_0] : memref<8x32xf32, #tpu.memory_space<vmem>>, vector<8x32xf32>
    %cst = arith.constant dense<0.000000e+00> : vector<8xf32>
    %1 = vector.multi_reduction <add>, %0, %cst [1] : vector<8x32xf32> to vector<8xf32>
    %2 = vector.shape_cast %1 : vector<8xf32> to vector<8x1xf32>
    %cst_1 = arith.constant 3.200000e+01 : f32
    %3 = vector.broadcast %cst_1 : f32 to vector<8x1xf32>
    %4 = arith.divf %2, %3 : vector<8x1xf32>
    %5 = vector.broadcast %4 : vector<8x1xf32> to vector<8x32xf32>
    %6 = arith.subf %0, %5 : vector<8x32xf32>
    %7 = arith.mulf %6, %6 : vector<8x32xf32>
    %cst_2 = arith.constant dense<0.000000e+00> : vector<8xf32>
    %8 = vector.multi_reduction <add>, %7, %cst_2 [1] : vector<8x32xf32> to vector<8xf32>
    %9 = vector.shape_cast %8 : vector<8xf32> to vector<8x1xf32>
    %cst_3 = arith.constant 3.200000e-02 : f32
    %10 = vector.broadcast %cst_3 : f32 to vector<8x1xf32>
    %11 = arith.addf %9, %10 : vector<8x1xf32>
    %12 = math.rsqrt %11 : vector<8x1xf32>
    %13 = vector.broadcast %12 : vector<8x1xf32> to vector<8x32xf32>
    %14 = arith.mulf %6, %13 : vector<8x32xf32>
    %15 = arith.negf %14 : vector<8x32xf32>
    %16 = math.exp %15 : vector<8x32xf32>
    %cst_4 = arith.constant 1.000000e+00 : f32
    %17 = vector.broadcast %cst_4 : f32 to vector<8x32xf32>
    %18 = arith.addf %17, %16 : vector<8x32xf32>
    %19 = arith.divf %17, %18 : vector<8x32xf32>
    %c0_5 = arith.constant 0 : index
    %20 = memref.load %arg1[%c0_5] : memref<1xf32, #tpu.memory_space<smem>>
    %cst_6 = arith.constant 1.000000e+00 : f32
    %21 = arith.subf %cst_6, %20 : f32
    %22 = vector.broadcast %21 : f32 to vector<8x32xf32>
    %23 = arith.mulf %19, %22 : vector<8x32xf32>
    %24 = vector.broadcast %20 : f32 to vector<8x32xf32>
    %25 = arith.addf %24, %23 : vector<8x32xf32>
    %26 = arith.mulf %0, %25 : vector<8x32xf32>
    %c0_7 = arith.constant 0 : index
    %c0_8 = arith.constant 0 : index
    %27 = vector.load %arg3[%c0_7, %c0_8] : memref<8x32xf32, #tpu.memory_space<vmem>>, vector<8x32xf32>
    tpu.vector_store %arg3[%c0_7, %c0_8], %26 {strides = array<i32>} : memref<8x32xf32, #tpu.memory_space<vmem>>, vector<8x32xf32>,
    return
  }
  func.func @transform_0(%arg0: i32) -> i32 {
    %c0_i32 = arith.constant 0 : i32
    %c0_i32_0 = arith.constant 0 : i32
    return %c0_i32 : i32
  }
  func.func @transform_1(%arg0: i32) -> (i32, i32) {
    %c0_i32 = arith.constant 0 : i32
    %c0_i32_0 = arith.constant 0 : i32
    return %arg0, %c0_i32 : i32, i32
  }
  func.func @transform_2(%arg0: i32) -> (i32, i32) {
    %c0_i32 = arith.constant 0 : i32
    %c0_i32_0 = arith.constant 0 : i32
    return %arg0, %c0_i32 : i32, i32
  }
}

</mosaic_0001>

<bundles_post_ra>
// kernel: tpu_custom_call.1
= control target key start
LH: loop header
LB: loop body
LE: loop exit
PB: predicated region body
PF: predicated region fallthrough
CT: control target
= control target key end

     0   :  { %s624_s0 = inlined_call_operand.<no memory space> [shape: f32[1], index: 0, kind: input, shape index: {}]   ;;  %s625_s1 = inlined_call_operand.hbm [shape: f32[16,32], index: 1, kind: input, shape index: {}]   ;;  %s626_s2 = inlined_call_operand.hbm [shape: f32[16,32], index: 2, kind: output, shape index: {}]  }
   0x1   :  { %7 = sst [smem:[#allocation2]] %s624_s0 }
   0x2   :  { %8 = vsyncpa [#allocation4], 0 }
   0x3   :  { %10 = vsyncpa [#allocation4 + $0x1], 0 }
   0x4   :  { %11 = vsyncpa [#allocation5], 0 }
   0x5   :  { %13 = vsyncpa [#allocation5 + $0x1], 0  ;;  %s456_s11 = smov 0   ;;  %s458_s12 = smov 0  }
   0x6   :  { %s460_s13 = smov 0   ;;  %s462_s14 = smov 0  }
   0x7 LB: > { %s477_s0 = sadd.s32 4294967295, %s434_s14   ;;  %s273_s15 = sadd.s32 4294967294, %s434_s14   ;;  %s434_s14 = sphi %s462_s14, %s641_s14   ;;  %s430_s13 = sphi %s460_s13, %s640_s13   ;;  %s426_s12 = sphi %s458_s12, %s639_s12   ;;  %s422_s11 = sphi %s456_s11, %s638_s11  }
   0x8   : > { %s481_s16 = sadd.s32 1, %s434_s14   ;;  %s47_s17 = sadd.s32 1, %s430_s13 }
   0x9   : > { %s44_s18 = ssub.s32 %s434_s14, %s481_s16  ;;  %p54_p0 = scmp.ne.s32.totalorder %s430_s13, %s426_s12 }
   0xa   : > { %p45_p1 = scmp.eq.s32.totalorder %s44_s18, 0  ;;  %p55_p2 = scmp.eq.s32.totalorder %s434_s14, 0 }
   0xb   : > { %p60_p3 = scmp.ne.s32.totalorder %s426_s12, %s422_s11  ;;  %p61_p4 = scmp.eq.s32.totalorder %s477_s0, 0 }
   0xc   : > { %s493_s19 = scalar_select %p45_p1, %s430_s13, %s47_s17  }
   0xd   : > { %p495_p5 = por %p55_p2, %p54_p0  ;;  %p499_p6 = por %p61_p4, %p60_p3 }
   0xe   : > { %p84_p7 = scmp.eq.s32.totalorder %s477_s0, 1  ;;  %p90_p8 = scmp.eq.s32.totalorder %s273_s15, 1 }
   0xf   : > { %p298_p10 = scmp.lt.s32.totalorder %s434_s14, 2  ;;  %s113_s24 = sand.u32 1, %s430_s13  }
  0x10   : > { %p506_p11 = por %p84_p7, %p54_p0  ;;  %p510_p12 = por %p90_p8, %p60_p3 }
  0x11   : > { %s277_s25 = sshll.u32 %s434_s14, 7  ;;  %s276_s26 = sshll.u32 %s113_s24, 3 }
  0x12   : > { %s630_s22 = scalar_select %p506_p11, 1, 0 }
  0x13   : > { %s631_s23 = scalar_select %p510_p12, 1, 0 }
  0x14   : > { %s519_s29 = scalar_lea.hbm %s625_s1, %s277_s25  ;;  %s117_s30 = scalar_lea.vmem [#allocation3], %s276_s26 }
  0x15   : > { %s124_s3 = sshll.u32 %s117_s30, 4  ;;  %p523_p13 = pnand %p298_p10, %p495_p5  ;;  %s527_s3 = int_to_ptr.vmem [resolvable:$true] %s124_s3 }
  0x16   : > { %s114_s5 = scalar_lea.sflag [#allocation4], %s113_s24  ;;  %s338_s6 = scalar_lea.hbm %s519_s29, 128 }
  0x17   : > { %p339_p2 = scmp.ne.s32.totalorder %s519_s29, %s338_s6  ;;  %p340_p3 = pneg %p523_p13 }
  0x18   : > { %s343_s9 = scalar_lea.hbm %s625_s1, 256  ;;  %p344_p5 = scmp.lt.u32.totalorder %s519_s29, %s625_s1 }
  0x19   : > { %p341_p4 = pnand %p340_p3, %p339_p2  ;;  %p345_p8 = scmp.lt.u32.totalorder %s343_s9, %s338_s6 }
  0x1a   : > { %p347_p9 = scmp.lt.u32.totalorder %s338_s6, %s519_s29 }
  0x1b   : > { %p342_p7 = pneg %p341_p4  ;;  %p346_p10 = por %p345_p8, %p344_p5 }
  0x1d   : > { %p348_p0 = por %p347_p9, %p346_p10 }
  0x1f   : > { %p349_p1 = pnand %p348_p0, %p342_p7 }
  0x21   : > { %352 = shalt.err (!%p349_p1)
}
  0x22   : > { %s353_s17 = scalar_lea.vmem %s527_s3, 128  ;;  %s436_s18 = smov [#allocation3]  }
  0x23   : > { %p354_p2 = scmp.ne.s32.totalorder %s527_s3, %s353_s17  ;;  %s358_s20 = sshll.u32 %s436_s18, 4  ;;  %s359_s20 = int_to_ptr.vmem [resolvable:$false] %s358_s20 }
  0x24   : > { %s360_s24 = scalar_lea.vmem %s359_s20, 256  ;;  %p361_p11 = scmp.lt.s32.totalorder %s527_s3, %s359_s20 }
  0x25   : > { %p356_p4 = pnand %p354_p2, %p340_p3  ;;  %p362_p5 = scmp.lt.s32.totalorder %s360_s24, %s353_s17 }
  0x27   : > { %p357_p12 = pneg %p356_p4  ;;  %p363_p8 = por %p362_p5, %p361_p11 }
  0x29   : > { %p364_p9 = pnand %p363_p8, %p357_p12 }
  0x2b   : > { %367 = shalt.err (!%p364_p9)
}
  0x2c   : > { %293 = dma.hbm_to_vmem [thread:$0]  (!%p523_p13), %s519_s29, 128, %s527_s3, %s114_s5  }
  0x2d   : > { %p633_p0 = scmp.lt.s32.totalorder %s434_s14, 3  ;;  %p634_p1 = scmp.ge.s32.totalorder %s434_s14, 1 }
  0x2f   : > { %p130_p3 = pnand %p634_p1, %p633_p0 }
  0x30   : > { %s561_s25 = sand.u32 (!%p130_p3), 1, %s426_s12  }
  0x31   : > { %133 = sbr.rel (%p130_p3) target bundleno = 411 (0x19b), region = 28  ;;  %s279_s26 = sshll.u32 (!%p130_p3), %s561_s25, 3 }
  0x32   : > { %s136_s27 = scalar_lea.sflag (!%p130_p3), [#allocation4], %s561_s25  ;;  %s139_s28 = scalar_lea.vmem (!%p130_p3), [#allocation3], %s279_s26 }
  0x38   : > { %413 = dma.done.wait (%p499_p6), %s136_s27, 128  }
  0x39   : > { %415 = vsyncadd (%p499_p6), %s136_s27, 4294967168  ;;  %vm161_vm0 = vcmask 261120   ;;  %v160_v0 = vld [vmem:[%s139_s28] sm:$0xff]  ;;  %s181_s21 = sld [smem:[#allocation2]]  ;;  %s283_s30 = sshll.u32 %s477_s0, 7 }
  0x3a   : > { %v162_v1 = vsel %vm161_vm0, %v160_v0, 0.0  ;;  %s159_s3 = scalar_lea.vmem [#allocation6], %s279_s26  ;;  %s579_s7 = scalar_lea.hbm %s626_s2, %s283_s30 }
  0x3b   : > { %163 = vadd.xlane.f32.xlu0 %v162_v1  ;;  %s203_s4 = sshll.u32 %s159_s3, 4  ;;  %s190_s8 = scalar_lea.sflag [#allocation5], %s561_s25  ;;  %s581_s4 = int_to_ptr.vmem [resolvable:$true] %s203_s4 }
  0x3c   : > { %s368_s9 = scalar_lea.vmem %s581_s4, 128  ;;  %p635_p11 = scmp.ne.s32.totalorder %s630_s22, 0 }
  0x3d   : > { %p369_p6 = scmp.ne.s32.totalorder %s581_s4, %s368_s9  ;;  %s437_s0 = smov [#allocation6]  }
  0x3e   : > { %s372_s10 = sshll.u32 %s437_s0, 4  ;;  %s373_s10 = int_to_ptr.vmem [resolvable:$false] %s372_s10 }
  0x3f   : > { %s182_s29 = ssub.f32 1.0, %s181_s21  ;;  %v185_v16 = vstv %s181_s21  ;;  %p370_p12 = pnand %p369_p6, %p635_p11 }
  0x40   : > { %s374_s15 = scalar_lea.vmem %s373_s10, 256  ;;  %p375_p7 = scmp.lt.s32.totalorder %s581_s4, %s373_s10 }
  0x41   : > { %v183_v14 = vstv %s182_s29  ;;  %p371_p13 = pneg %p370_p12  ;;  %p376_p10 = scmp.lt.s32.totalorder %s374_s15, %s368_s9 }
  0x43   : > { %p377_p2 = por %p376_p10, %p375_p7 }
  0x45   : > { %p378_p4 = pnand %p377_p2, %p371_p13 }
  0xc8   : > { %v164_v2 = vpop.xlane.xlu0 %163 }
  0xc9   : > { %v166_v3 = vmul.f32 0.03125, %v164_v2 }
  0xcb   : > { %v167_v4 = vsub.f32 %v160_v0, %v166_v3 }
  0xcd   : > { %v168_v5 = vmul.f32 %v167_v4, %v167_v4 }
  0xcf   : > { %v169_v6 = vsel %vm161_vm0, %v168_v5, 0.0 }
  0xd0   : > { %170 = vadd.xlane.f32.xlu0 %v169_v6 }
 0x15d   : > { %v171_v7 = vpop.xlane.xlu0 %170 }
 0x15e   : > { %v172_v8 = vadd.f32 0.032, %v171_v7 }
 0x160   : > { %332 = vrsqrt.f32 %v172_v8 }
 0x16a   : > { %v333_v9 = vpop.eup %332 }
 0x16b   : > { %v174_v10 = vmul.f32 %v333_v9, %v167_v4 }
 0x16d   : > { %v281_v11 = vmul.f32 -1.442695, %v174_v10 }
 0x16f   : > { %334 = vpow2.f32 %v281_v11 }
 0x179   : > { %v335_v12 = vpop.eup %334 }
 0x17a   : > { %v178_v13 = vadd.f32 1.0, %v335_v12 }
 0x17c   : > { %336 = vrcp.f32 %v178_v13 }
 0x186   : > { %v337_v15 = vpop.eup %336 }
 0x187   : > { %v184_v17 = vmul.f32 %v337_v15, %v183_v14 }
 0x189   : > { %v186_v18 = vadd.f32 %v185_v16, %v184_v17 }
 0x18b   : > { %v187_v19 = vmul.f32 %v186_v18, %v160_v0 }
 0x18d   : > { %188 = vst.msk [vmem:[%s159_s3] sm:$0xff] %vm161_vm0, %v187_v19 }
 0x18e   : > { %381 = shalt.err (!%p378_p4)
}
 0x18f   : > { %s382_s17 = scalar_lea.hbm %s579_s7, 128  ;;  %s386_s24 = scalar_lea.hbm %s626_s2, 256 }
 0x190   : > { %p383_p5 = scmp.ne.s32.totalorder %s579_s7, %s382_s17  ;;  %p387_p0 = scmp.lt.u32.totalorder %s579_s7, %s626_s2 }
 0x191   : > { %p388_p1 = scmp.lt.u32.totalorder %s386_s24, %s382_s17  ;;  %p390_p6 = scmp.lt.u32.totalorder %s382_s17, %s579_s7 }
 0x192   : > { %p384_p8 = pnand %p383_p5, %p635_p11 }
 0x193   : > { %p389_p3 = por %p388_p1, %p387_p0 }
 0x194   : > { %p385_p9 = pneg %p384_p8 }
 0x195   : > { %p391_p12 = por %p390_p6, %p389_p3 }
 0x197   : > { %p392_p13 = pnand %p391_p12, %p385_p9 }
 0x199   : > { %395 = shalt.err (!%p392_p13)
}
 0x19a   : > { %288 = dma.vmem_to_hbm [thread:$0]  (%p635_p11), %s581_s4, 128, %s579_s7, %s190_s8  }
 0x19b PF: > { %s215_s27 = sand.u32 1, %s422_s11   ;;  %p636_p7 = scmp.ne.s32.totalorder %s631_s23, 0 }
 0x19c   : > { %p637_p10 = scmp.ge.s32.totalorder %s434_s14, 2  ;;  %s216_s28 = scalar_lea.sflag [#allocation5], %s215_s27 }
 0x19e   : > { %p295_p2 = pnand %p637_p10, %p636_p7 }
 0x1a0   : > { %417 = dma.done.wait (!%p295_p2), %s216_s28, 128  }
 0x1a1   : > { %419 = vsyncadd (!%p295_p2), %s216_s28, 4294967168  ;;  %p16_p4 = scmp.ge.s32.totalorder %s481_s16, 4   ;;  %s638_s11 = smov %s426_s12 }
 0x1a2   : > { %s639_s12 = smov %s430_s13  ;;  %s640_s13 = smov %s493_s19 }
 0x1a3   : > { %s641_s14 = smov %s481_s16  ;;  %18 = sbr.rel (!%p16_p4) target bundleno = 7 (0x7), region = 73 }
 0x1aa   :  { %221 = vsyncpa [#allocation4], 1 }
 0x1ab   :  { %223 = vsyncpa [#allocation4 + $0x1], 1 }
 0x1ac   :  { %224 = vsyncpa [#allocation5], 1 }
 0x1ad   :  { %226 = vsyncpa [#allocation5 + $0x1], 1 }

</bundles_post_ra>
